<compile_context>
chip_gen: v5e
topology: v5e:2x2
jax: 0.10.0
libtpu: 0.0.40
codegen_flags: <defaults>
</compile_context>

<pallas_src>
import math

import jax
import jax.numpy as jnp
from jax.experimental import pallas as pl
from jax.experimental.pallas import tpu as pltpu

IN_FEATURES = 201
HID = 100
HID_PAD = 128  # lane-aligned hidden width (zero padded)


def _round_up(n, m):
    return ((n + m - 1) // m) * m


def _fcboardnet_kernel(
    x_ref,
    w1_ref, b1_ref,   # 201 -> 128 (padded from 100)
    w2_ref, b2_ref,   # 128 -> 128
    w3_ref, b3_ref,   # 128 -> 128
    w4_ref, b4_ref,   # final head, stored as a (1, 128) row + (1, 1) bias
    out_ref,
):
    f32 = jnp.float32
    x = x_ref[...].astype(f32)

    def linear_relu(h, w_ref, b_ref):
        y = jnp.dot(h, w_ref[...], preferred_element_type=f32)
        return jnp.maximum(y + b_ref[...], 0.0)

    h = linear_relu(x, w1_ref, b1_ref)   # (TB, 128)
    h = linear_relu(h, w2_ref, b2_ref)   # (TB, 128)
    h = linear_relu(h, w3_ref, b3_ref)   # (TB, 128)

    # Final 100(->128 padded) -> 1 head: VPU multiply + XLU lane reduction
    # instead of an N=1 MXU matmul (frees MXU / result-FIFO pressure).
    y = jnp.sum(h * w4_ref[...], axis=-1, keepdims=True) + b4_ref[...]
    y = jnp.maximum(y, 0.0)              # final ReLU in the PyTorch model
    out_ref[...] = y.astype(out_ref.dtype)


def fcboardnet_forward(x, packed, *, block_batch=256):
    """x: (B, ...) with prod(...) == 201. Returns (B, 1) float32."""
    B = x.shape[0]
    x2d = x.reshape(B, -1).astype(jnp.float32)   # nn.Flatten
    assert x2d.shape[1] == IN_FEATURES

    # Batch tile: multiple of 8 (sublane), capped at block_batch. Pad B up.
    TB = min(block_batch, _round_up(B, 8))
    B_pad = _round_up(B, TB)
    if B_pad != B:
        x2d = jnp.pad(x2d, ((0, B_pad - B), (0, 0)))
    grid = (B_pad // TB,)

    weight_args = (
        packed["w1"], packed["b1"],
        packed["w2"], packed["b2"],
        packed["w3"], packed["b3"],
        packed["w4"], packed["b4"],
    )

    in_specs = [pl.BlockSpec((TB, IN_FEATURES), lambda i: (i, 0))]
    # Weights/biases: full-array blocks with a constant index_map -> resident.
    in_specs += [pl.BlockSpec(w.shape, lambda i: (0, 0)) for w in weight_args]

    flops = 2 * B_pad * (IN_FEATURES * HID + HID * HID + HID * HID + HID)
    bytes_accessed = 4 * (x2d.size + B_pad + sum(w.size for w in weight_args))

    out = pl.pallas_call(
        _fcboardnet_kernel,
        out_shape=jax.ShapeDtypeStruct((B_pad, 1), jnp.float32),
        grid=grid,
        in_specs=in_specs,
        out_specs=pl.BlockSpec((TB, 1), lambda i: (i, 0)),
        compiler_params=pltpu.CompilerParams(
            dimension_semantics=("parallel",),
            vmem_limit_bytes=32 * 1024 * 1024,
        ),
        cost_estimate=pl.CostEstimate(
            flops=flops, transcendentals=0, bytes_accessed=bytes_accessed),
    )(x2d, *weight_args)
    return out[:B]


def _xavier_uniform(key, fan_in, fan_out):
    # matches torch.nn.init.xavier_uniform_ (gain=1); stored as (in, out)
    bound = math.sqrt(6.0 / (fan_in + fan_out))
    return jax.random.uniform(
        key, (fan_in, fan_out), dtype=jnp.float32, minval=-bound, maxval=bound
    )


def init_params(key):
    """Unpadded parameters, (in, out) layout, biases zero (as in PyTorch)."""
    k1, k2, k3, k4 = jax.random.split(key, 4)
    return {
        "w1": _xavier_uniform(k1, IN_FEATURES, HID),
        "b1": jnp.zeros((1, HID), jnp.float32),
        "w2": _xavier_uniform(k2, HID, HID),
        "b2": jnp.zeros((1, HID), jnp.float32),
        "w3": _xavier_uniform(k3, HID, HID),
        "b3": jnp.zeros((1, HID), jnp.float32),
        "w4": _xavier_uniform(k4, HID, 1),
        "b4": jnp.zeros((1, 1), jnp.float32),
    }


def pack_params(p):
    """Zero-pad hidden width 100 -> 128 so every matmul is 128-lane dense.

    Padding is numerically exact: extra weight rows/cols and biases are zero,
    and ReLU(0) = 0, so padded hidden channels stay identically zero.
    """
    pad_c = HID_PAD - HID
    return {
        "w1": jnp.pad(p["w1"], ((0, 0), (0, pad_c))),          # (201, 128)
        "b1": jnp.pad(p["b1"], ((0, 0), (0, pad_c))),          # (1, 128)
        "w2": jnp.pad(p["w2"], ((0, pad_c), (0, pad_c))),      # (128, 128)
        "b2": jnp.pad(p["b2"], ((0, 0), (0, pad_c))),          # (1, 128)
        "w3": jnp.pad(p["w3"], ((0, pad_c), (0, pad_c))),      # (128, 128)
        "b3": jnp.pad(p["b3"], ((0, 0), (0, pad_c))),          # (1, 128)
        "w4": jnp.pad(p["w4"].T, ((0, 0), (0, pad_c))),        # (1, 128) row
        "b4": p["b4"],                                         # (1, 1)
    }


def _reference_forward(x, p):
    relu = lambda v: jnp.maximum(v, 0.0)
    h = relu(x @ p["w1"] + p["b1"])
    h = relu(h @ p["w2"] + p["b2"])
    h = relu(h @ p["w3"] + p["b3"])
    return relu(h @ p["w4"] + p["b4"])


if __name__ == "__main__":
    batch = 16

    key = jax.random.PRNGKey(0)
    k_params, k_x = jax.random.split(key)
    params = init_params(k_params)
    packed = pack_params(params)
    x = jax.random.normal(k_x, (batch, IN_FEATURES), dtype=jnp.float32)

    out = fcboardnet_forward(x, packed)
    out = jax.block_until_ready(out)

    ref = _reference_forward(x.reshape(batch, -1), params)
    assert out.shape == (batch, 1)
    assert jnp.allclose(out, ref, atol=1e-4, rtol=1e-4), (
        float(jnp.max(jnp.abs(out - ref)))
    )

    print("KERNEL_OK")
</pallas_src>

<mosaic_0001>
module attributes {stable_mosaic.version = 11 : i64} {
  func.func @_fcboardnet_kernel(%arg0: i32, %arg1: memref<16x201xf32, #tpu.memory_space<vmem>>, %arg2: memref<201x128xf32, #tpu.memory_space<vmem>>, %arg3: memref<1x128xf32, #tpu.memory_space<vmem>>, %arg4: memref<128x128xf32, #tpu.memory_space<vmem>>, %arg5: memref<1x128xf32, #tpu.memory_space<vmem>>, %arg6: memref<128x128xf32, #tpu.memory_space<vmem>>, %arg7: memref<1x128xf32, #tpu.memory_space<vmem>>, %arg8: memref<1x128xf32, #tpu.memory_space<vmem>>, %arg9: memref<1x1xf32, #tpu.memory_space<vmem>>, %arg10: memref<16x1xf32, #tpu.memory_space<vmem>>) attributes {dimension_semantics = [#tpu.dimension_semantics<parallel>], iteration_bounds = array<i64: 1>, scalar_prefetch = 0 : i64, scratch_operands = 0 : i64, tpu.core_type = #tpu.core_type<tc>, window_params = [{transform_indices = @transform_0, window_bounds = array<i64: 16, 201>}, {pipeline_mode = #tpu.pipeline_mode<synchronous>, transform_indices = @transform_1, window_bounds = array<i64: 201, 128>}, {pipeline_mode = #tpu.pipeline_mode<synchronous>, transform_indices = @transform_2, window_bounds = array<i64: 1, 128>}, {pipeline_mode = #tpu.pipeline_mode<synchronous>, transform_indices = @transform_3, window_bounds = array<i64: 128, 128>}, {pipeline_mode = #tpu.pipeline_mode<synchronous>, transform_indices = @transform_4, window_bounds = array<i64: 1, 128>}, {pipeline_mode = #tpu.pipeline_mode<synchronous>, transform_indices = @transform_5, window_bounds = array<i64: 128, 128>}, {pipeline_mode = #tpu.pipeline_mode<synchronous>, transform_indices = @transform_6, window_bounds = array<i64: 1, 128>}, {pipeline_mode = #tpu.pipeline_mode<synchronous>, transform_indices = @transform_7, window_bounds = array<i64: 1, 128>}, {pipeline_mode = #tpu.pipeline_mode<synchronous>, transform_indices = @transform_8, window_bounds = array<i64: 1, 1>}, {transform_indices = @transform_9, window_bounds = array<i64: 16, 1>}]} {
    %c0 = arith.constant 0 : index
    %c0_0 = arith.constant 0 : index
    %0 = vector.load %arg1[%c0, %c0_0] : memref<16x201xf32, #tpu.memory_space<vmem>>, vector<16x201xf32>
    %c0_1 = arith.constant 0 : index
    %c0_2 = arith.constant 0 : index
    %1 = vector.load %arg2[%c0_1, %c0_2] : memref<201x128xf32, #tpu.memory_space<vmem>>, vector<201x128xf32>
    %cst = arith.constant dense<0.000000e+00> : vector<16x128xf32>
    %2 = tpu.matmul %0, %1, %cst {dimension_numbers = #tpu.dot_dimension_numbers<[1], [0], [0], [1], [0, 0, 1, 1], [], []>} : vector<16x201xf32>, vector<201x128xf32>, vector<16x128xf32> -> vector<16x128xf32>
    %c0_3 = arith.constant 0 : index
    %c0_4 = arith.constant 0 : index
    %3 = vector.load %arg3[%c0_3, %c0_4] : memref<1x128xf32, #tpu.memory_space<vmem>>, vector<1x128xf32>
    %4 = vector.broadcast %3 : vector<1x128xf32> to vector<16x128xf32>
    %5 = arith.addf %2, %4 : vector<16x128xf32>
    %cst_5 = arith.constant 0.000000e+00 : f32
    %6 = vector.broadcast %cst_5 : f32 to vector<16x128xf32>
    %7 = arith.maximumf %5, %6 : vector<16x128xf32>
    %c0_6 = arith.constant 0 : index
    %c0_7 = arith.constant 0 : index
    %8 = vector.load %arg4[%c0_6, %c0_7] : memref<128x128xf32, #tpu.memory_space<vmem>>, vector<128x128xf32>
    %cst_8 = arith.constant dense<0.000000e+00> : vector<16x128xf32>
    %9 = tpu.matmul %7, %8, %cst_8 {dimension_numbers = #tpu.dot_dimension_numbers<[1], [0], [0], [1], [0, 0, 1, 1], [], []>} : vector<16x128xf32>, vector<128x128xf32>, vector<16x128xf32> -> vector<16x128xf32>
    %c0_9 = arith.constant 0 : index
    %c0_10 = arith.constant 0 : index
    %10 = vector.load %arg5[%c0_9, %c0_10] : memref<1x128xf32, #tpu.memory_space<vmem>>, vector<1x128xf32>
    %11 = vector.broadcast %10 : vector<1x128xf32> to vector<16x128xf32>
    %12 = arith.addf %9, %11 : vector<16x128xf32>
    %cst_11 = arith.constant 0.000000e+00 : f32
    %13 = vector.broadcast %cst_11 : f32 to vector<16x128xf32>
    %14 = arith.maximumf %12, %13 : vector<16x128xf32>
    %c0_12 = arith.constant 0 : index
    %c0_13 = arith.constant 0 : index
    %15 = vector.load %arg6[%c0_12, %c0_13] : memref<128x128xf32, #tpu.memory_space<vmem>>, vector<128x128xf32>
    %cst_14 = arith.constant dense<0.000000e+00> : vector<16x128xf32>
    %16 = tpu.matmul %14, %15, %cst_14 {dimension_numbers = #tpu.dot_dimension_numbers<[1], [0], [0], [1], [0, 0, 1, 1], [], []>} : vector<16x128xf32>, vector<128x128xf32>, vector<16x128xf32> -> vector<16x128xf32>
    %c0_15 = arith.constant 0 : index
    %c0_16 = arith.constant 0 : index
    %17 = vector.load %arg7[%c0_15, %c0_16] : memref<1x128xf32, #tpu.memory_space<vmem>>, vector<1x128xf32>
    %18 = vector.broadcast %17 : vector<1x128xf32> to vector<16x128xf32>
    %19 = arith.addf %16, %18 : vector<16x128xf32>
    %cst_17 = arith.constant 0.000000e+00 : f32
    %20 = vector.broadcast %cst_17 : f32 to vector<16x128xf32>
    %21 = arith.maximumf %19, %20 : vector<16x128xf32>
    %c0_18 = arith.constant 0 : index
    %c0_19 = arith.constant 0 : index
    %22 = vector.load %arg8[%c0_18, %c0_19] : memref<1x128xf32, #tpu.memory_space<vmem>>, vector<1x128xf32>
    %23 = vector.broadcast %22 : vector<1x128xf32> to vector<16x128xf32>
    %24 = arith.mulf %21, %23 : vector<16x128xf32>
    %cst_20 = arith.constant dense<0.000000e+00> : vector<16xf32>
    %25 = vector.multi_reduction <add>, %24, %cst_20 [1] : vector<16x128xf32> to vector<16xf32>
    %26 = vector.shape_cast %25 : vector<16xf32> to vector<16x1xf32>
    %c0_21 = arith.constant 0 : index
    %c0_22 = arith.constant 0 : index
    %27 = vector.load %arg9[%c0_21, %c0_22] : memref<1x1xf32, #tpu.memory_space<vmem>>, vector<1x1xf32>
    %28 = vector.broadcast %27 : vector<1x1xf32> to vector<16x1xf32>
    %29 = arith.addf %26, %28 : vector<16x1xf32>
    %cst_23 = arith.constant 0.000000e+00 : f32
    %30 = vector.broadcast %cst_23 : f32 to vector<16x1xf32>
    %31 = arith.maximumf %29, %30 : vector<16x1xf32>
    %c0_24 = arith.constant 0 : index
    %c0_25 = arith.constant 0 : index
    %32 = vector.load %arg10[%c0_24, %c0_25] : memref<16x1xf32, #tpu.memory_space<vmem>>, vector<16x1xf32>
    tpu.vector_store %arg10[%c0_24, %c0_25], %31 {strides = array<i32>} : memref<16x1xf32, #tpu.memory_space<vmem>>, vector<16x1xf32>,
    return
  }
  func.func @transform_0(%arg0: i32) -> (i32, i32) {
    %c0_i32 = arith.constant 0 : i32
    %c0_i32_0 = arith.constant 0 : i32
    return %arg0, %c0_i32 : i32, i32
  }
  func.func @transform_1(%arg0: i32) -> (i32, i32) {
    %c0_i32 = arith.constant 0 : i32
    %c0_i32_0 = arith.constant 0 : i32
    %c0_i32_1 = arith.constant 0 : i32
    return %c0_i32, %c0_i32_0 : i32, i32
  }
  func.func @transform_2(%arg0: i32) -> (i32, i32) {
    %c0_i32 = arith.constant 0 : i32
    %c0_i32_0 = arith.constant 0 : i32
    %c0_i32_1 = arith.constant 0 : i32
    return %c0_i32, %c0_i32_0 : i32, i32
  }
  func.func @transform_3(%arg0: i32) -> (i32, i32) {
    %c0_i32 = arith.constant 0 : i32
    %c0_i32_0 = arith.constant 0 : i32
    %c0_i32_1 = arith.constant 0 : i32
    return %c0_i32, %c0_i32_0 : i32, i32
  }
  func.func @transform_4(%arg0: i32) -> (i32, i32) {
    %c0_i32 = arith.constant 0 : i32
    %c0_i32_0 = arith.constant 0 : i32
    %c0_i32_1 = arith.constant 0 : i32
    return %c0_i32, %c0_i32_0 : i32, i32
  }
  func.func @transform_5(%arg0: i32) -> (i32, i32) {
    %c0_i32 = arith.constant 0 : i32
    %c0_i32_0 = arith.constant 0 : i32
    %c0_i32_1 = arith.constant 0 : i32
    return %c0_i32, %c0_i32_0 : i32, i32
  }
  func.func @transform_6(%arg0: i32) -> (i32, i32) {
    %c0_i32 = arith.constant 0 : i32
    %c0_i32_0 = arith.constant 0 : i32
    %c0_i32_1 = arith.constant 0 : i32
    return %c0_i32, %c0_i32_0 : i32, i32
  }
  func.func @transform_7(%arg0: i32) -> (i32, i32) {
    %c0_i32 = arith.constant 0 : i32
    %c0_i32_0 = arith.constant 0 : i32
    %c0_i32_1 = arith.constant 0 : i32
    return %c0_i32, %c0_i32_0 : i32, i32
  }
  func.func @transform_8(%arg0: i32) -> (i32, i32) {
    %c0_i32 = arith.constant 0 : i32
    %c0_i32_0 = arith.constant 0 : i32
    %c0_i32_1 = arith.constant 0 : i32
    return %c0_i32, %c0_i32_0 : i32, i32
  }
  func.func @transform_9(%arg0: i32) -> (i32, i32) {
    %c0_i32 = arith.constant 0 : i32
    %c0_i32_0 = arith.constant 0 : i32
    return %arg0, %c0_i32 : i32, i32
  }
}

</mosaic_0001>

<bundles_post_ra>
// kernel: tpu_custom_call.1
= control target key start
LH: loop header
LB: loop body
LE: loop exit
PB: predicated region body
PF: predicated region fallthrough
CT: control target
= control target key end

     0   :  { %s519_s0 = inlined_call_operand.hbm [shape: f32[16,201], index: 0, kind: input, shape index: {}]   ;;  %s520_s1 = inlined_call_operand.hbm [shape: f32[201,128], index: 1, kind: input, shape index: {}]   ;;  %s521_s2 = inlined_call_operand.vmem [shape: f32[1,128], index: 2, kind: input, shape index: {}]   ;;  %s522_s3 = inlined_call_operand.hbm [shape: f32[128,128], index: 3, kind: input, shape index: {}]   ;;  %s523_s4 = inlined_call_operand.vmem [shape: f32[1,128], index: 4, kind: input, shape index: {}]   ;;  %s524_s5 = inlined_call_operand.hbm [shape: f32[128,128], index: 5, kind: input, shape index: {}]   ;;  %s525_s6 = inlined_call_operand.vmem [shape: f32[1,128], index: 6, kind: input, shape index: {}]   ;;  %s526_s7 = inlined_call_operand.vmem [shape: f32[1,128], index: 7, kind: input, shape index: {}]   ;;  %s527_s8 = inlined_call_operand.<no memory space> [shape: f32[1,1], index: 8, kind: input, shape index: {}]   ;;  %s528_s9 = inlined_call_operand.vmem [shape: f32[16,1], index: 9, kind: output, shape index: {}]  }
   0x1   :  { %v14_v0 = vstv %s527_s8 }
   0x2   :  { %15 = vst [vmem:[#allocation2] sm:$0x1] %v14_v0 }
   0x3   :  { %16 = vsyncpa [#allocation4], 0 }
   0x4   :  { %17 = vsyncpa [#allocation6], 0  ;;  %s36_s13 = sshll.u32 %s520_s1, 4  ;;  %s37_s13 = int_to_ptr.hbm [resolvable:$true] %s36_s13 }
   0x5   :  { %18 = vsyncpa [#allocation9], 0  ;;  %s426_s14 = smov [#allocation5]   ;;  %s23_s18 = sshll.u32 %s519_s0, 4  ;;  %s24_s18 = int_to_ptr.hbm [resolvable:$true] %s23_s18 }
   0x6   :  { %s38_s15 = sshll.u32 %s426_s14, 4  ;;  %s427_s19 = smov 128   ;;  %s39_s15 = int_to_ptr.vmem [resolvable:$true] %s38_s15 }
   0x7   :  { %s428_s20 = smov 8   ;;  %s429_s8 = smov [#allocation3]  }
   0x8   :  { %44 = dma.hbm_to_vmem [thread:$0]  %s37_s13, 3328, %s39_s15, [#allocation6], %s427_s19, %s427_s19, %s428_s20  }
   0x9   :  { %s25_s21 = sshll.u32 %s429_s8, 4  ;;  %s430_s22 = smov 256   ;;  %s26_s21 = int_to_ptr.vmem [resolvable:$true] %s25_s21 }
   0xa   :  { %s431_s23 = smov 16   ;;  %s51_s25 = sshll.u32 %s522_s3, 4  ;;  %s52_s25 = int_to_ptr.hbm [resolvable:$true] %s51_s25 }
   0xb   :  { %31 = dma.hbm_to_vmem [thread:$0]  %s24_s18, 512, %s26_s21, [#allocation4], %s430_s22, %s430_s22, %s431_s23  }
   0xc   :  { %s432_s26 = smov [#allocation7]   ;;  %s66_s29 = sshll.u32 %s524_s5, 4  ;;  %s67_s29 = int_to_ptr.hbm [resolvable:$true] %s66_s29 }
   0xd   :  { %s53_s27 = sshll.u32 %s432_s26, 4  ;;  %s433_s30 = smov [#allocation8]   ;;  %s54_s27 = int_to_ptr.vmem [resolvable:$true] %s53_s27 }
   0xe   :  { %59 = dma.hbm_to_vmem [thread:$0]  %s52_s25, 2048, %s54_s27, [#allocation6], %s427_s19, %s427_s19, %s428_s20  }
   0xf   :  { %s68_s10 = sshll.u32 %s433_s30, 4  ;;  %s69_s10 = int_to_ptr.vmem [resolvable:$true] %s68_s10 }
  0x10   :  { %74 = dma.hbm_to_vmem [thread:$0]  %s67_s29, 2048, %s69_s10, [#allocation9], %s427_s19, %s427_s19, %s428_s20  }
  0x11   :  { %420 = dma.done.wait [#allocation4], 512  }
  0x12   :  { %421 = vsyncadd [#allocation4], 4294966784 }
  0x13   :  { %422 = dma.done.wait [#allocation6], 5376  }
  0x14   :  { %423 = vsyncadd [#allocation6], 4294961920 }
  0x15   :  { %424 = dma.done.wait [#allocation9], 2048  }
  0x16   :  { %425 = vsyncadd [#allocation9], 4294965248  ;;  %v116_v1 = vld [vmem:[#allocation5 + $0x78] sm:$0xff]  ;;  %v115_v2 = vld [vmem:[#allocation5 + $0x70] sm:$0xff]  ;;  %vm138_vm0 = vcmask 1040384   ;;  %vm131_vm1 = vcmask 596992  }
  0x17   :  { %142 = vmatpush.msra.mxu0 %v116_v1  ;;  %v114_v3 = vld [vmem:[#allocation5 + $0x68] sm:$0xff]  ;;  %v125_v5 = vld [vmem:[#allocation5 + $0xc0] sm:$0xff]  ;;  %v124_v7 = vld [vmem:[#allocation5 + $0xb8] sm:$0xff]  ;;  %vm298_vm2 = vcmask 7168  }
  0x18   :  { %v126_v4 = vld [vmem:[#allocation5 + $0xc8] sm:$0x1]  ;;  %v113_v6 = vld [vmem:[#allocation5 + $0x60] sm:$0xff]  ;;  %v112_v8 = vld [vmem:[#allocation5 + $0x58] sm:$0xff] }
  0x19   :  { %143 = vmatpush.msra.mxu0 %v115_v2  ;;  %308 = vmatpush.msk.msra.mxu1 %vm138_vm0, %v126_v4  ;;  %v123_v9 = vld [vmem:[#allocation5 + $0xb0] sm:$0xff]  ;;  %v122_v11 = vld [vmem:[#allocation5 + $0xa8] sm:$0xff]  ;;  %v121_v13 = vld [vmem:[#allocation5 + $0xa0] sm:$0xff] }
  0x1a   :  { %v111_v10 = vld [vmem:[#allocation5 + $0x50] sm:$0xff]  ;;  %v110_v12 = vld [vmem:[#allocation5 + $0x48] sm:$0xff]  ;;  %v204_v15 = vld [vmem:[#allocation7 + $0x70] sm:$0xff] }
  0x1b   :  { %144 = vmatpush.msra.mxu0 %v114_v3  ;;  %172 = vmatpush.msra.mxu1 %v125_v5  ;;  %v205_v14 = vld [vmem:[#allocation7 + $0x78] sm:$0xff]  ;;  %v109_v16 = vld [vmem:[#allocation5 + $0x40] sm:$0xff]  ;;  %v120_v17 = vld [vmem:[#allocation5 + $0x98] sm:$0xff] }
  0x1c   :  { %210 = vmatpush.msra.mxu2 %v205_v14  ;;  %v108_v18 = vld [vmem:[#allocation5 + $0x38] sm:$0xff]  ;;  %v119_v19 = vld [vmem:[#allocation5 + $0x90] sm:$0xff]  ;;  %v118_v23 = vld [vmem:[#allocation5 + $0x88] sm:$0xff] }
  0x1d   :  { %145 = vmatpush.msra.mxu0 %v113_v6  ;;  %173 = vmatpush.msra.mxu1 %v124_v7  ;;  %v203_v20 = vld [vmem:[#allocation7 + $0x68] sm:$0xff]  ;;  %v202_v21 = vld [vmem:[#allocation7 + $0x60] sm:$0xff]  ;;  %v201_v24 = vld [vmem:[#allocation7 + $0x58] sm:$0xff] }
  0x1e   :  { %211 = vmatpush.msra.mxu2 %v204_v15  ;;  %v107_v22 = vld [vmem:[#allocation5 + $0x30] sm:$0xff]  ;;  %v106_v25 = vld [vmem:[#allocation5 + $0x28] sm:$0xff]  ;;  %v117_v26 = vld [vmem:[#allocation5 + $0x80] sm:$0xff] }
  0x1f   :  { %146 = vmatpush.msra.mxu0 %v112_v8  ;;  %174 = vmatpush.msra.mxu1 %v123_v9  ;;  %v98_v27 = vld [vmem:[#allocation3 + $0x8] sm:$0xff]  ;;  %v200_v28 = vld [vmem:[#allocation7 + $0x50] sm:$0xff]  ;;  %v199_v30 = vld [vmem:[#allocation7 + $0x48] sm:$0xff] }
  0x20   :  { %212 = vmatpush.msra.mxu2 %v203_v20  ;;  %v105_v29 = vld [vmem:[#allocation5 + $0x20] sm:$0xff]  ;;  %v104_v31 = vld [vmem:[#allocation5 + $0x18] sm:$0xff]  ;;  %v198_v32 = vld [vmem:[#allocation7 + $0x40] sm:$0xff] }
  0x21   :  { %147 = vmatpush.msra.mxu0 %v111_v10  ;;  %175 = vmatpush.msra.mxu1 %v122_v11  ;;  %v103_v33 = vld [vmem:[#allocation5 + $0x10] sm:$0xff]  ;;  %v197_v34 = vld [vmem:[#allocation7 + $0x38] sm:$0xff]  ;;  %v100_v36 = vld [vmem:[#allocation3 + $0x18] sm:$0xff] }
  0x22   :  { %213 = vmatpush.msra.mxu2 %v202_v21  ;;  %v102_v35 = vld [vmem:[#allocation5 + $0x8] sm:$0xff]  ;;  %v196_v37 = vld [vmem:[#allocation7 + $0x30] sm:$0xff]  ;;  %v195_v40 = vld [vmem:[#allocation7 + $0x28] sm:$0xff] }
  0x23   :  { %148 = vmatpush.msra.mxu0 %v110_v12  ;;  %176 = vmatpush.msra.mxu1 %v121_v13  ;;  %v101_v38 = vld [vmem:[#allocation5] sm:$0xff]  ;;  %v194_v41 = vld [vmem:[#allocation7 + $0x20] sm:$0xff]  ;;  %v193_v43 = vld [vmem:[#allocation7 + $0x18] sm:$0xff] }
  0x24   :  { %214 = vmatpush.msra.mxu2 %v201_v24  ;;  %v97_v39 = vld [vmem:[#allocation3] sm:$0xff]  ;;  %v99_v42 = vld [vmem:[#allocation3 + $0x10] sm:$0xff]  ;;  %v191_v45 = vld [vmem:[#allocation7 + $0x8] sm:$0xff] }
  0x25   :  { %149 = vmatpush.msra.mxu0 %v109_v16  ;;  %177 = vmatpush.msra.mxu1 %v120_v17  ;;  %v192_v44 = vld [vmem:[#allocation7 + $0x10] sm:$0xff]  ;;  %v190_v46 = vld [vmem:[#allocation7] sm:$0xff]  ;;  %v250_v47 = vld [vmem:[#allocation8 + $0x78] sm:$0xff] }
  0x26   :  { %215 = vmatpush.msra.mxu2 %v200_v28  ;;  %v249_v48 = vld [vmem:[#allocation8 + $0x70] sm:$0xff]  ;;  %255 = vmatpush.msra.mxu3 %v250_v47  ;;  %v248_v49 = vld [vmem:[#allocation8 + $0x68] sm:$0xff]  ;;  %v247_v50 = vld [vmem:[#allocation8 + $0x60] sm:$0xff] }
  0x27   :  { %150 = vmatpush.msra.mxu0 %v108_v18  ;;  %178 = vmatpush.msra.mxu1 %v119_v19  ;;  %v246_v51 = vld [vmem:[#allocation8 + $0x58] sm:$0xff]  ;;  %v245_v52 = vld [vmem:[#allocation8 + $0x50] sm:$0xff]  ;;  %v244_v53 = vld [vmem:[#allocation8 + $0x48] sm:$0xff] }
  0x28   :  { %216 = vmatpush.msra.mxu2 %v199_v30  ;;  %256 = vmatpush.msra.mxu3 %v249_v48  ;;  %v243_v54 = vld [vmem:[#allocation8 + $0x40] sm:$0xff]  ;;  %v319_v55 = vld [vmem:[%s521_s2] ss:$0 sm:$0xff]  ;;  %v242_v56 = vld [vmem:[#allocation8 + $0x38] sm:$0xff] }
  0x29   :  { %151 = vmatpush.msra.mxu0 %v107_v22  ;;  %179 = vmatpush.msra.mxu1 %v118_v23  ;;  %v241_v58 = vld [vmem:[#allocation8 + $0x30] sm:$0xff]  ;;  %v240_v61 = vld [vmem:[#allocation8 + $0x28] sm:$0xff]  ;;  %v239_v63 = vld [vmem:[#allocation8 + $0x20] sm:$0xff] }
  0x2a   :  { %217 = vmatpush.msra.mxu2 %v198_v32  ;;  %257 = vmatpush.msra.mxu3 %v248_v49  ;;  %v238_v1 = vld [vmem:[#allocation8 + $0x18] sm:$0xff]  ;;  %v237_v7 = vld [vmem:[#allocation8 + $0x10] sm:$0xff]  ;;  %v236_v8 = vld [vmem:[#allocation8 + $0x8] sm:$0xff] }
  0x2b   :  { %152 = vmatpush.msra.mxu0 %v106_v25  ;;  %180 = vmatpush.msra.mxu1 %v117_v26  ;;  %v235_v9 = vld [vmem:[#allocation8] sm:$0xff]  ;;  %v320_v10 = vld [vmem:[%s523_s4] ss:$0 sm:$0xff] }
  0x2c   :  { %309 = vmatmul.msk.f32.vlgmr.msra.gmra.mxu1 %vm131_vm1, %v98_v27  ;;  %218 = vmatpush.msra.mxu2 %v197_v34  ;;  %v321_v17 = vld [vmem:[%s525_s6] ss:$0 sm:$0xff] }
  0x2d   :  { %153 = vmatpush.msra.mxu0 %v105_v29  ;;  %258 = vmatpush.msra.mxu3 %v247_v50  ;;  %v322_v20 = vld [vmem:[%s526_s7] ss:$0 sm:$0xff] }
  0x2e   :  { %219 = vmatpush.msra.mxu2 %v196_v37  ;;  %v323_v27 = vld [vmem:[#allocation2] ss:$0 sm:$0xff] }
  0x2f   :  { %154 = vmatpush.msra.mxu0 %v104_v31  ;;  %259 = vmatpush.msra.mxu3 %v246_v51 }
  0x30   :  { %220 = vmatpush.msra.mxu2 %v195_v40 }
  0x31   :  { %155 = vmatpush.msra.mxu0 %v103_v33  ;;  %260 = vmatpush.msra.mxu3 %v245_v52 }
  0x32   :  { %221 = vmatpush.msra.mxu2 %v194_v41 }
  0x33   :  { %156 = vmatpush.msra.mxu0 %v102_v35  ;;  %261 = vmatpush.msra.mxu3 %v244_v53 }
  0x34   :  { %310 = vmatmul.msk.f32.gmra.mxu1 %vm131_vm1, %v100_v36  ;;  %222 = vmatpush.msra.mxu2 %v193_v43 }
  0x35   :  { %157 = vmatpush.msra.mxu0 %v101_v38  ;;  %262 = vmatpush.msra.mxu3 %v243_v54 }
  0x36   :  { %158 = vmatmul.f32.vlgmr.msra.gmra.mxu0 %v97_v39  ;;  %223 = vmatpush.msra.mxu2 %v192_v44 }
  0x37   :  { %263 = vmatpush.msra.mxu3 %v242_v56 }
  0x38   :  { %224 = vmatpush.msra.mxu2 %v191_v45 }
  0x39   :  { %264 = vmatpush.msra.mxu3 %v241_v58 }
  0x3a   :  { %225 = vmatpush.msra.mxu2 %v190_v46 }
  0x3b   :  { %265 = vmatpush.msra.mxu3 %v240_v61 }
  0x3d   :  { %266 = vmatpush.msra.mxu3 %v239_v63 }
  0x3e   :  { %161 = vmatmul.f32.gmra.mxu0 %v99_v42 }
  0x3f   :  { %267 = vmatpush.msra.mxu3 %v238_v1 }
  0x41   :  { %268 = vmatpush.msra.mxu3 %v237_v7 }
  0x43   :  { %269 = vmatpush.msra.mxu3 %v236_v8 }
  0x45   :  { %270 = vmatpush.msra.mxu3 %v235_v9 }
  0xa9   :  { %v182_v57 = vpop.f32.mrf.mxu1 }
  0xb1   :  { %v185_v3 = vpop.f32.mrf.mxu1 }
  0xb3   :  { %v159_v59 = vpop.f32.mrf.mxu0 }
  0xb4   :  { %v160_v60 = vadd.f32 %v319_v55, %v159_v59 }
  0xb6   :  { %v183_v62 = vadd.f32 %v182_v57, %v160_v60 }
  0xb8   :  { %v188_v0 = vmax.f32 %v183_v62, 0.0 }
  0xba   :  { %226 = vmatmul.f32.vlgmr.msra.gmra.mxu2 %v188_v0 }
  0xbb   :  { %v162_v2 = vpop.f32.mrf.mxu0 }
  0xbc   :  { %v163_v4 = vadd.f32 %v319_v55, %v162_v2 }
  0xbe   :  { %v186_v5 = vadd.f32 %v185_v3, %v163_v4 }
  0xc0   :  { %v189_v6 = vmax.f32 %v186_v5, 0.0 }
  0xc2   :  { %229 = vmatmul.f32.gmra.mxu2 %v189_v6 }
 0x13d   :  { %v227_v11 = vpop.f32.mrf.mxu2 }
 0x13e   :  { %v228_v12 = vadd.f32 %v320_v10, %v227_v11 }
 0x140   :  { %v233_v13 = vmax.f32 %v228_v12, 0.0 }
 0x142   :  { %271 = vmatmul.f32.vlgmr.msra.gmra.mxu3 %v233_v13 }
 0x145   :  { %v230_v14 = vpop.f32.mrf.mxu2 }
 0x146   :  { %v231_v15 = vadd.f32 %v320_v10, %v230_v14 }
 0x148   :  { %v234_v16 = vmax.f32 %v231_v15, 0.0 }
 0x14a   :  { %274 = vmatmul.f32.gmra.mxu3 %v234_v16 }
 0x1c5   :  { %v272_v18 = vpop.f32.mrf.mxu3 }
 0x1c6   :  { %v273_v19 = vadd.f32 %v321_v17, %v272_v18 }
 0x1c8   :  { %v278_v21 = vmax.f32 %v273_v19, 0.0 }
 0x1ca   :  { %v284_v22 = vmul.f32 %v322_v20, %v278_v21 }
 0x1cc   :  { %286 = vadd.xlane.f32.xlu0 %v284_v22 }
 0x1cd   :  { %v275_v23 = vpop.f32.mrf.mxu3 }
 0x1ce   :  { %v276_v24 = vadd.f32 %v321_v17, %v275_v23 }
 0x1d0   :  { %v279_v25 = vmax.f32 %v276_v24, 0.0 }
 0x1d2   :  { %v285_v26 = vmul.f32 %v322_v20, %v279_v25 }
 0x1d4   :  { %288 = vadd.xlane.f32.xlu0 %v285_v26 }
 0x23f   :  { %v287_v28 = vpop.xlane.xlu0 %286 }
 0x240   :  { %v294_v29 = vadd.f32 %v323_v27, %v287_v28 }
 0x242   :  { %v296_v30 = vmax.f32 %v294_v29, 0.0 }
 0x244   :  { %299 = vst.msk [vmem:[%s528_s9] sm:$0xff] %vm298_vm2, %v296_v30 }
 0x247   :  { %v289_v31 = vpop.xlane.xlu0 %288 }
 0x248   :  { %v295_v32 = vadd.f32 %v323_v27, %v289_v31 }
 0x24a   :  { %v297_v33 = vmax.f32 %v295_v32, 0.0 }
 0x24c   :  { %300 = vst.msk [vmem:[%s528_s9 + $0x8] sm:$0xff] %vm298_vm2, %v297_v33 }
 0x24d   :  { %305 = vsyncpa [#allocation4], 1 }
 0x24e   :  { %306 = vsyncpa [#allocation6], 1 }
 0x24f   :  { %307 = vsyncpa [#allocation9], 1 }

</bundles_post_ra>
